<compile_context>
chip_gen: v6e
topology: v6e:2x2x1
jax: 0.10.0
libtpu: 0.0.40
codegen_flags: <defaults>
</compile_context>

<pallas_src>
import jax
import jax.numpy as jnp
from jax.experimental import pallas as pl
from jax.experimental.pallas import tpu as pltpu

NUM_INPUTS = 784
NUM_HIDDENS = [256, 128]
NUM_OUTPUTS = 10

H1, H2 = NUM_HIDDENS
D_OUT_PAD = 128    # lane-dense output width (cols 10..127 are zero weights/bias)


def _round_up(x, m):
    return (x + m - 1) // m * m


def mlp_kernel(x_ref, w1_ref, b1_ref, w2_ref, b2_ref, w3_ref, b3_ref, o_ref):
    # Cast the activation tile to bf16 in-kernel (MXU-native); x stays f32 in HBM.
    x = x_ref[...].astype(jnp.bfloat16)

    # Layer 1: Linear(784 -> 256) + ReLU   (bf16 matmul, f32 accumulate)
    h = jnp.dot(x, w1_ref[...], preferred_element_type=jnp.float32)
    h = jnp.maximum(h + b1_ref[...], 0.0)

    # Layer 2: Linear(256 -> 128) + ReLU
    h = jnp.dot(h.astype(jnp.bfloat16), w2_ref[...],
                preferred_element_type=jnp.float32)
    h = jnp.maximum(h + b2_ref[...], 0.0)

    # Output layer: Linear(128 -> 128-padded), no activation.
    out = jnp.dot(h.astype(jnp.bfloat16), w3_ref[...],
                  preferred_element_type=jnp.float32)
    o_ref[...] = (out + b3_ref[...]).astype(o_ref.dtype)


def init_params(key):
    """Init mimicking torch.nn.Linear default (U[-1/sqrt(fan_in), +1/sqrt(fan_in)]).

    Weights are stored transposed relative to torch (shape (in, out)) so the kernel
    computes X @ W + b == torch's X @ W_t.T + b.
    """
    sizes = [NUM_INPUTS] + NUM_HIDDENS + [NUM_OUTPUTS]
    params = []
    for i in range(len(sizes) - 1):
        fan_in, fan_out = sizes[i], sizes[i + 1]
        key, kw, kb = jax.random.split(key, 3)
        bound = 1.0 / (fan_in ** 0.5)
        w = jax.random.uniform(kw, (fan_in, fan_out), jnp.float32, -bound, bound)
        b = jax.random.uniform(kb, (1, fan_out), jnp.float32, -bound, bound)
        params += [w, b]
    return tuple(params)


def _choose_tiling(batch, tb):
    """Pick (TB, B_pad, n_steps) with <=7 rows of pad waste per grid step and
    >=2 grid steps whenever the batch is big enough (keeps both v7x TCs busy)."""
    b8 = _round_up(batch, 8)
    n_steps = max(pl.cdiv(b8, tb), 2 if b8 >= 16 else 1)
    tile = _round_up(pl.cdiv(b8, n_steps), 8)
    return tile, n_steps * tile, n_steps


def mlp_forward(x, params, *, tb=1024):
    # X.view(-1, num_inputs) equivalent (plain-JAX glue, no data movement).
    x2 = x.reshape(-1, NUM_INPUTS).astype(jnp.float32)
    B = x2.shape[0]

    TB, B_pad, n_steps = _choose_tiling(B, tb)
    if B_pad != B:
        # Only a handful of batch rows of padding; no column padding, no dtype copy.
        x2 = jnp.pad(x2, ((0, B_pad - B), (0, 0)))

    w1, b1, w2, b2, w3, b3 = params
    # Weight/bias casts & the small lane-pad of the output layer happen once here;
    # these tensors are tiny compared to the activation stream.
    w1_p = w1.astype(jnp.bfloat16)                                        # (784, 256)
    w2_p = w2.astype(jnp.bfloat16)                                        # (256, 128)
    w3_p = jnp.pad(w3, ((0, 0), (0, D_OUT_PAD - NUM_OUTPUTS))).astype(jnp.bfloat16)
    b1_p = b1.astype(jnp.float32)
    b2_p = b2.astype(jnp.float32)
    b3_p = jnp.pad(b3, ((0, 0), (0, D_OUT_PAD - NUM_OUTPUTS))).astype(jnp.float32)

    grid = (n_steps,)

    in_specs = [
        pl.BlockSpec((TB, NUM_INPUTS), lambda i: (i, 0)),      # x: tiled over batch (f32)
        pl.BlockSpec((NUM_INPUTS, H1), lambda i: (0, 0)),      # w1: VMEM-resident
        pl.BlockSpec((1, H1), lambda i: (0, 0)),               # b1
        pl.BlockSpec((H1, H2), lambda i: (0, 0)),              # w2
        pl.BlockSpec((1, H2), lambda i: (0, 0)),               # b2
        pl.BlockSpec((H2, D_OUT_PAD), lambda i: (0, 0)),       # w3 (lane-padded)
        pl.BlockSpec((1, D_OUT_PAD), lambda i: (0, 0)),        # b3 (lane-padded)
    ]
    out_spec = pl.BlockSpec((TB, D_OUT_PAD), lambda i: (i, 0))

    flops = 2 * B_pad * (NUM_INPUTS * H1 + H1 * H2 + H2 * D_OUT_PAD)
    bytes_accessed = (
        B_pad * NUM_INPUTS * 4                                   # x read (f32)
        + (w1_p.size + w2_p.size + w3_p.size) * 2                # weights (bf16)
        + (b1_p.size + b2_p.size + b3_p.size) * 4                # biases (f32)
        + B_pad * D_OUT_PAD * 2                                  # output write (bf16)
    )
    cost = pl.CostEstimate(flops=flops, transcendentals=0,
                           bytes_accessed=bytes_accessed)

    out_padded = pl.pallas_call(
        mlp_kernel,
        out_shape=jax.ShapeDtypeStruct((B_pad, D_OUT_PAD), jnp.bfloat16),
        grid=grid,
        in_specs=in_specs,
        out_specs=out_spec,
        compiler_params=pltpu.CompilerParams(
            dimension_semantics=("parallel",),
        ),
        cost_estimate=cost,
    )(x2, w1_p, b1_p, w2_p, b2_p, w3_p, b3_p)

    # Strip batch padding + lane padding; return f32 logits like the torch module.
    return out_padded[:B, :NUM_OUTPUTS].astype(jnp.float32)


def mlp_reference(x, params):
    """Pure-JAX f32 reference for correctness checking."""
    x2 = x.reshape(-1, NUM_INPUTS).astype(jnp.float32)
    w1, b1, w2, b2, w3, b3 = params
    h = jnp.maximum(x2 @ w1 + b1, 0.0)
    h = jnp.maximum(h @ w2 + b2, 0.0)
    return h @ w3 + b3


if __name__ == "__main__":
    key = jax.random.PRNGKey(0)
    key, kx = jax.random.split(key)

    # NCHW input like MNIST: (batch=8, channels=1, 28, 28) -> flattened to 784
    x = jax.random.normal(kx, (8, 1, 28, 28), dtype=jnp.float32)
    params = init_params(jax.random.PRNGKey(0))

    out = mlp_forward(x, params)
    out = jax.block_until_ready(out)

    ref = mlp_reference(x, params)
    assert out.shape == (8, NUM_OUTPUTS), out.shape
    # bf16 matmul inputs / bf16 writeback with f32 accumulation -> loose tolerance.
    assert jnp.allclose(out, ref, atol=5e-2, rtol=5e-2), "mismatch vs reference"

    print("KERNEL_OK")
</pallas_src>

<mosaic_0001>
module attributes {stable_mosaic.version = 11 : i64} {
  func.func @mlp_kernel(%arg0: i32, %arg1: memref<8x784xf32, #tpu.memory_space<vmem>>, %arg2: memref<784x256xbf16, #tpu.memory_space<vmem>>, %arg3: memref<1x256xf32, #tpu.memory_space<vmem>>, %arg4: memref<256x128xbf16, #tpu.memory_space<vmem>>, %arg5: memref<1x128xf32, #tpu.memory_space<vmem>>, %arg6: memref<128x128xbf16, #tpu.memory_space<vmem>>, %arg7: memref<1x128xf32, #tpu.memory_space<vmem>>, %arg8: memref<8x128xbf16, #tpu.memory_space<vmem>>) attributes {dimension_semantics = [#tpu.dimension_semantics<parallel>], iteration_bounds = array<i64: 1>, scalar_prefetch = 0 : i64, scratch_operands = 0 : i64, tpu.core_type = #tpu.core_type<tc>, window_params = [{transform_indices = @transform_0, window_bounds = array<i64: 8, 784>}, {pipeline_mode = #tpu.pipeline_mode<synchronous>, transform_indices = @transform_1, window_bounds = array<i64: 784, 256>}, {pipeline_mode = #tpu.pipeline_mode<synchronous>, transform_indices = @transform_2, window_bounds = array<i64: 1, 256>}, {pipeline_mode = #tpu.pipeline_mode<synchronous>, transform_indices = @transform_3, window_bounds = array<i64: 256, 128>}, {pipeline_mode = #tpu.pipeline_mode<synchronous>, transform_indices = @transform_4, window_bounds = array<i64: 1, 128>}, {pipeline_mode = #tpu.pipeline_mode<synchronous>, transform_indices = @transform_5, window_bounds = array<i64: 128, 128>}, {pipeline_mode = #tpu.pipeline_mode<synchronous>, transform_indices = @transform_6, window_bounds = array<i64: 1, 128>}, {transform_indices = @transform_7, window_bounds = array<i64: 8, 128>}]} {
    %c0 = arith.constant 0 : index
    %c0_0 = arith.constant 0 : index
    %0 = vector.load %arg1[%c0, %c0_0] : memref<8x784xf32, #tpu.memory_space<vmem>>, vector<8x784xf32>
    %1 = arith.truncf %0 : vector<8x784xf32> to vector<8x784xbf16>
    %c0_1 = arith.constant 0 : index
    %c0_2 = arith.constant 0 : index
    %2 = vector.load %arg2[%c0_1, %c0_2] : memref<784x256xbf16, #tpu.memory_space<vmem>>, vector<784x256xbf16>
    %cst = arith.constant dense<0.000000e+00> : vector<8x256xf32>
    %3 = tpu.matmul %1, %2, %cst {dimension_numbers = #tpu.dot_dimension_numbers<[1], [0], [0], [1], [0, 0, 1, 1], [], []>} : vector<8x784xbf16>, vector<784x256xbf16>, vector<8x256xf32> -> vector<8x256xf32>
    %c0_3 = arith.constant 0 : index
    %c0_4 = arith.constant 0 : index
    %4 = vector.load %arg3[%c0_3, %c0_4] : memref<1x256xf32, #tpu.memory_space<vmem>>, vector<1x256xf32>
    %5 = vector.broadcast %4 : vector<1x256xf32> to vector<8x256xf32>
    %6 = arith.addf %3, %5 : vector<8x256xf32>
    %cst_5 = arith.constant 0.000000e+00 : f32
    %7 = vector.broadcast %cst_5 : f32 to vector<8x256xf32>
    %8 = arith.maximumf %6, %7 : vector<8x256xf32>
    %9 = arith.truncf %8 : vector<8x256xf32> to vector<8x256xbf16>
    %c0_6 = arith.constant 0 : index
    %c0_7 = arith.constant 0 : index
    %10 = vector.load %arg4[%c0_6, %c0_7] : memref<256x128xbf16, #tpu.memory_space<vmem>>, vector<256x128xbf16>
    %cst_8 = arith.constant dense<0.000000e+00> : vector<8x128xf32>
    %11 = tpu.matmul %9, %10, %cst_8 {dimension_numbers = #tpu.dot_dimension_numbers<[1], [0], [0], [1], [0, 0, 1, 1], [], []>} : vector<8x256xbf16>, vector<256x128xbf16>, vector<8x128xf32> -> vector<8x128xf32>
    %c0_9 = arith.constant 0 : index
    %c0_10 = arith.constant 0 : index
    %12 = vector.load %arg5[%c0_9, %c0_10] : memref<1x128xf32, #tpu.memory_space<vmem>>, vector<1x128xf32>
    %13 = vector.broadcast %12 : vector<1x128xf32> to vector<8x128xf32>
    %14 = arith.addf %11, %13 : vector<8x128xf32>
    %cst_11 = arith.constant 0.000000e+00 : f32
    %15 = vector.broadcast %cst_11 : f32 to vector<8x128xf32>
    %16 = arith.maximumf %14, %15 : vector<8x128xf32>
    %17 = arith.truncf %16 : vector<8x128xf32> to vector<8x128xbf16>
    %c0_12 = arith.constant 0 : index
    %c0_13 = arith.constant 0 : index
    %18 = vector.load %arg6[%c0_12, %c0_13] : memref<128x128xbf16, #tpu.memory_space<vmem>>, vector<128x128xbf16>
    %cst_14 = arith.constant dense<0.000000e+00> : vector<8x128xf32>
    %19 = tpu.matmul %17, %18, %cst_14 {dimension_numbers = #tpu.dot_dimension_numbers<[1], [0], [0], [1], [0, 0, 1, 1], [], []>} : vector<8x128xbf16>, vector<128x128xbf16>, vector<8x128xf32> -> vector<8x128xf32>
    %c0_15 = arith.constant 0 : index
    %c0_16 = arith.constant 0 : index
    %20 = vector.load %arg7[%c0_15, %c0_16] : memref<1x128xf32, #tpu.memory_space<vmem>>, vector<1x128xf32>
    %21 = vector.broadcast %20 : vector<1x128xf32> to vector<8x128xf32>
    %22 = arith.addf %19, %21 : vector<8x128xf32>
    %23 = arith.truncf %22 : vector<8x128xf32> to vector<8x128xbf16>
    %c0_17 = arith.constant 0 : index
    %c0_18 = arith.constant 0 : index
    %24 = vector.load %arg8[%c0_17, %c0_18] : memref<8x128xbf16, #tpu.memory_space<vmem>>, vector<8x128xbf16>
    tpu.vector_store %arg8[%c0_17, %c0_18], %23 {strides = array<i32>} : memref<8x128xbf16, #tpu.memory_space<vmem>>, vector<8x128xbf16>,
    return
  }
  func.func @transform_0(%arg0: i32) -> (i32, i32) {
    %c0_i32 = arith.constant 0 : i32
    %c0_i32_0 = arith.constant 0 : i32
    return %arg0, %c0_i32 : i32, i32
  }
  func.func @transform_1(%arg0: i32) -> (i32, i32) {
    %c0_i32 = arith.constant 0 : i32
    %c0_i32_0 = arith.constant 0 : i32
    %c0_i32_1 = arith.constant 0 : i32
    return %c0_i32, %c0_i32_0 : i32, i32
  }
  func.func @transform_2(%arg0: i32) -> (i32, i32) {
    %c0_i32 = arith.constant 0 : i32
    %c0_i32_0 = arith.constant 0 : i32
    %c0_i32_1 = arith.constant 0 : i32
    return %c0_i32, %c0_i32_0 : i32, i32
  }
  func.func @transform_3(%arg0: i32) -> (i32, i32) {
    %c0_i32 = arith.constant 0 : i32
    %c0_i32_0 = arith.constant 0 : i32
    %c0_i32_1 = arith.constant 0 : i32
    return %c0_i32, %c0_i32_0 : i32, i32
  }
  func.func @transform_4(%arg0: i32) -> (i32, i32) {
    %c0_i32 = arith.constant 0 : i32
    %c0_i32_0 = arith.constant 0 : i32
    %c0_i32_1 = arith.constant 0 : i32
    return %c0_i32, %c0_i32_0 : i32, i32
  }
  func.func @transform_5(%arg0: i32) -> (i32, i32) {
    %c0_i32 = arith.constant 0 : i32
    %c0_i32_0 = arith.constant 0 : i32
    %c0_i32_1 = arith.constant 0 : i32
    return %c0_i32, %c0_i32_0 : i32, i32
  }
  func.func @transform_6(%arg0: i32) -> (i32, i32) {
    %c0_i32 = arith.constant 0 : i32
    %c0_i32_0 = arith.constant 0 : i32
    %c0_i32_1 = arith.constant 0 : i32
    return %c0_i32, %c0_i32_0 : i32, i32
  }
  func.func @transform_7(%arg0: i32) -> (i32, i32) {
    %c0_i32 = arith.constant 0 : i32
    %c0_i32_0 = arith.constant 0 : i32
    return %arg0, %c0_i32 : i32, i32
  }
}

</mosaic_0001>

<bundles_post_ra>
// kernel: tpu_custom_call.1
= control target key start
LH: loop header
LB: loop body
LE: loop exit
PB: predicated region body
PF: predicated region fallthrough
CT: control target
= control target key end

     0   :  { %12 = vsyncpa [#allocation3], 0  ;;  %s1727_s0 = inlined_call_operand.hbm [shape: f32[8,784], index: 0, kind: input, shape index: {}]   ;;  %s1728_s1 = inlined_call_operand.hbm [shape: bf16[784,256], index: 1, kind: input, shape index: {}]   ;;  %s1729_s2 = inlined_call_operand.vmem [shape: f32[1,256], index: 2, kind: input, shape index: {}]   ;;  %s1730_s3 = inlined_call_operand.hbm [shape: bf16[256,128], index: 3, kind: input, shape index: {}]   ;;  %s1731_s4 = inlined_call_operand.vmem [shape: f32[1,128], index: 4, kind: input, shape index: {}]   ;;  %s1732_s5 = inlined_call_operand.hbm [shape: bf16[128,128], index: 5, kind: input, shape index: {}]   ;;  %s1733_s6 = inlined_call_operand.vmem [shape: f32[1,128], index: 6, kind: input, shape index: {}]   ;;  %s1734_s7 = inlined_call_operand.hbm [shape: bf16[8,128], index: 7, kind: output, shape index: {}]  }
   0x1   :  { %13 = vsyncpa [#allocation6], 0 }
   0x2   :  { %14 = vsyncpa [#allocation9], 0 }
   0x3   :  { %15 = vsyncpa [#allocation4], 0  ;;  %s1641_s24 = smov [#allocation5]  }
   0x4   :  { %s31_s25 = sshll.u32 %s1641_s24, 4  ;;  %s32_s25 = int_to_ptr.vmem [resolvable:$true] %s31_s25 }
   0x5   :  { %s1541_s26 = scalar_lea.vmem %s32_s25, 12544  ;;  %p1546_p1 = scmp.lt.s32.totalorder %s32_s25, %s32_s25 }
   0x6   :  { %p1542_p0 = scmp.ne.s32.totalorder %s32_s25, %s1541_s26  ;;  %p1547_p2 = scmp.lt.s32.totalorder %s1541_s26, %s1541_s26 }
   0x8   :  { %p1548_p3 = por %p1547_p2, %p1546_p1 }
   0xa   :  { %p1549_p4 = pnand %p1548_p3, %p1542_p0 }
   0xc   :  { %1552 = shalt.err (!%p1549_p4)
}
   0xd   :  { %s1642_s27 = smov 128   ;;  %s1643_s28 = smov 8  }
   0xe   :  { %37 = dma.hbm_to_vmem [thread:$0]  %s1728_s1, 12544, %s32_s25, [#allocation6], %s1642_s27, %s1642_s27, %s1643_s28  }
   0xf   :  { %s1644_s8 = smov [#allocation2]   ;;  %s1645_s10 = smov [#allocation7]  }
  0x10   :  { %s22_s9 = sshll.u32 %s1644_s8, 4  ;;  %s45_s11 = sshll.u32 %s1645_s10, 4  ;;  %s23_s9 = int_to_ptr.vmem [resolvable:$true] %s22_s9  ;;  %s46_s11 = int_to_ptr.vmem [resolvable:$true] %s45_s11 }
  0x11   :  { %s1561_s12 = scalar_lea.vmem %s23_s9, 896  ;;  %p1566_p6 = scmp.lt.s32.totalorder %s23_s9, %s23_s9 }
  0x12   :  { %p1562_p5 = scmp.ne.s32.totalorder %s23_s9, %s1561_s12  ;;  %p1567_p7 = scmp.lt.s32.totalorder %s1561_s12, %s1561_s12 }
  0x14   :  { %p1568_p8 = por %p1567_p7, %p1566_p6 }
  0x16   :  { %p1569_p9 = pnand %p1568_p8, %p1562_p5 }
  0x18   :  { %1572 = shalt.err (!%p1569_p9)
}
  0x19   :  { %25 = dma.hbm_to_vmem [thread:$0]  %s1727_s0, 896, %s23_s9, [#allocation3]  }
  0x1a   :  { %s1581_s15 = scalar_lea.vmem %s46_s11, 2048  ;;  %p1586_p11 = scmp.lt.s32.totalorder %s46_s11, %s46_s11 }
  0x1b   :  { %p1582_p10 = scmp.ne.s32.totalorder %s46_s11, %s1581_s15  ;;  %p1587_p12 = scmp.lt.s32.totalorder %s1581_s15, %s1581_s15 }
  0x1d   :  { %p1588_p13 = por %p1587_p12, %p1586_p11 }
  0x1f   :  { %p1589_p0 = pnand %p1588_p13, %p1582_p10 }
  0x21   :  { %1592 = shalt.err (!%p1589_p0)
}
  0x22   :  { %s1646_s1 = smov 64   ;;  %s1647_s16 = smov 4  }
  0x23   :  { %51 = dma.hbm_to_vmem [thread:$0]  %s1730_s3, 2048, %s46_s11, [#allocation6], %s1646_s1, %s1646_s1, %s1647_s16  }
  0x24   :  { %s1648_s19 = smov [#allocation8]  }
  0x25   :  { %s59_s20 = sshll.u32 %s1648_s19, 4  ;;  %s60_s20 = int_to_ptr.vmem [resolvable:$true] %s59_s20 }
  0x26   :  { %s1601_s21 = scalar_lea.vmem %s60_s20, 1024  ;;  %p1606_p2 = scmp.lt.s32.totalorder %s60_s20, %s60_s20 }
  0x27   :  { %p1602_p1 = scmp.ne.s32.totalorder %s60_s20, %s1601_s21  ;;  %p1607_p3 = scmp.lt.s32.totalorder %s1601_s21, %s1601_s21 }
  0x29   :  { %p1608_p4 = por %p1607_p3, %p1606_p2 }
  0x2b   :  { %p1609_p5 = pnand %p1608_p4, %p1602_p1 }
  0x2d   :  { %1612 = shalt.err (!%p1609_p5)
}
  0x2e   :  { %65 = dma.hbm_to_vmem [thread:$0]  %s1732_s5, 1024, %s60_s20, [#allocation9], %s1646_s1, %s1646_s1, %s1647_s16  }
  0x2f   :  { %1633 = dma.done.wait [#allocation3], 896  }
  0x30   :  { %1634 = vsyncadd [#allocation3], 4294966400 }
  0x31   :  { %1635 = dma.done.wait [#allocation6], 14592  }
  0x32   :  { %1636 = vsyncadd [#allocation6], 4294952704 }
  0x33   :  { %1637 = dma.done.wait [#allocation9], 1024  }
  0x34   :  { %1638 = vsyncadd [#allocation9], 4294966272  ;;  %v1362_v0 = vld [vmem:[#allocation5 + $0x74] ss:$8 sps:$4 sm:$0xff]   ;;  %v1364_v1 = vld [vmem:[#allocation5 + $0x70] ss:$8 sps:$4 sm:$0xff]  }
  0x35   :  { %699 = vmatprep.subr.bf16.mxu0 %v1362_v0  ;;  %v1365_v2 = vld [vmem:[#allocation5 + $0x174] ss:$8 sps:$4 sm:$0xff]   ;;  %v1367_v3 = vld [vmem:[#allocation5 + $0x170] ss:$8 sps:$4 sm:$0xff]   ;;  %v1368_v4 = vld [vmem:[#allocation5 + $0x64] ss:$8 sps:$4 sm:$0xff]  }
  0x36   :  { %700 = vmatpush1.bf16.msra.mxu0 %v1364_v1  ;;  %v1370_v5 = vld [vmem:[#allocation5 + $0x60] ss:$8 sps:$4 sm:$0xff]   ;;  %740 = vmatprep.subr.bf16.mxu1 %v1365_v2  ;;  %v1371_v6 = vld [vmem:[#allocation5 + $0x164] ss:$8 sps:$4 sm:$0xff]   ;;  %v1374_v8 = vld [vmem:[#allocation5 + $0x54] ss:$8 sps:$4 sm:$0xff]  }
  0x37   :  { %741 = vmatpush1.bf16.msra.mxu1 %v1367_v3  ;;  %701 = vmatprep.subr.bf16.mxu0 %v1368_v4  ;;  %v1373_v7 = vld [vmem:[#allocation5 + $0x160] ss:$8 sps:$4 sm:$0xff]   ;;  %v1376_v9 = vld [vmem:[#allocation5 + $0x50] ss:$8 sps:$4 sm:$0xff]   ;;  %v1377_v10 = vld [vmem:[#allocation5 + $0x154] ss:$8 sps:$4 sm:$0xff]  }
  0x38   :  { %742 = vmatprep.subr.bf16.mxu1 %v1371_v6  ;;  %v1380_v11 = vld [vmem:[#allocation5 + $0x44] ss:$8 sps:$4 sm:$0xff]   ;;  %v1379_v12 = vld [vmem:[#allocation5 + $0x150] ss:$8 sps:$4 sm:$0xff]   ;;  %v1382_v14 = vld [vmem:[#allocation5 + $0x40] ss:$8 sps:$4 sm:$0xff]  }
  0x39   :  { %v1383_v13 = vld [vmem:[#allocation5 + $0x144] ss:$8 sps:$4 sm:$0xff]   ;;  %v1386_v15 = vld [vmem:[#allocation5 + $0x34] ss:$8 sps:$4 sm:$0xff]   ;;  %v1385_v16 = vld [vmem:[#allocation5 + $0x140] ss:$8 sps:$4 sm:$0xff]  }
  0x3a   :  { %702 = vmatpush1.bf16.msra.mxu0 %v1370_v5  ;;  %v1389_v17 = vld [vmem:[#allocation5 + $0x134] ss:$8 sps:$4 sm:$0xff]   ;;  %v1388_v18 = vld [vmem:[#allocation5 + $0x30] ss:$8 sps:$4 sm:$0xff]   ;;  %v1392_v19 = vld [vmem:[#allocation5 + $0x24] ss:$8 sps:$4 sm:$0xff]  }
  0x3b   :  { %703 = vmatprep.subr.bf16.mxu0 %v1374_v8  ;;  %743 = vmatpush1.bf16.msra.mxu1 %v1373_v7  ;;  %v1391_v20 = vld [vmem:[#allocation5 + $0x130] ss:$8 sps:$4 sm:$0xff]   ;;  %v1395_v21 = vld [vmem:[#allocation5 + $0x124] ss:$8 sps:$4 sm:$0xff]   ;;  %v1394_v22 = vld [vmem:[#allocation5 + $0x20] ss:$8 sps:$4 sm:$0xff]  }
  0x3c   :  { %744 = vmatprep.subr.bf16.mxu1 %v1377_v10  ;;  %v1398_v23 = vld [vmem:[#allocation5 + $0x14] ss:$8 sps:$4 sm:$0xff]   ;;  %v1397_v24 = vld [vmem:[#allocation5 + $0x120] ss:$8 sps:$4 sm:$0xff]   ;;  %v1400_v26 = vld [vmem:[#allocation5 + $0x10] ss:$8 sps:$4 sm:$0xff]  }
  0x3d   :  { %v1401_v25 = vld [vmem:[#allocation5 + $0x114] ss:$8 sps:$4 sm:$0xff]   ;;  %v1404_v27 = vld [vmem:[#allocation5 + $0x4] ss:$8 sps:$4 sm:$0xff]   ;;  %v1403_v28 = vld [vmem:[#allocation5 + $0x110] ss:$8 sps:$4 sm:$0xff]  }
  0x3e   :  { %704 = vmatpush1.bf16.msra.mxu0 %v1376_v9  ;;  %v1407_v29 = vld [vmem:[#allocation5 + $0x104] ss:$8 sps:$4 sm:$0xff]   ;;  %v1406_v30 = vld [vmem:[#allocation5] ss:$8 sps:$4 sm:$0xff]   ;;  %v1410_v31 = vld [vmem:[#allocation5 + $0xf4] ss:$8 sps:$4 sm:$0xff]  }
  0x3f   :  { %705 = vmatprep.subr.bf16.mxu0 %v1380_v11  ;;  %745 = vmatpush1.bf16.msra.mxu1 %v1379_v12  ;;  %v1409_v32 = vld [vmem:[#allocation5 + $0x100] ss:$8 sps:$4 sm:$0xff]   ;;  %v1413_v33 = vld [vmem:[#allocation5 + $0x1f4] ss:$8 sps:$4 sm:$0xff]   ;;  %v1412_v34 = vld [vmem:[#allocation5 + $0xf0] ss:$8 sps:$4 sm:$0xff]  }
  0x40   :  { %746 = vmatprep.subr.bf16.mxu1 %v1383_v13  ;;  %v1416_v35 = vld [vmem:[#allocation5 + $0xe4] ss:$8 sps:$4 sm:$0xff]   ;;  %v1415_v36 = vld [vmem:[#allocation5 + $0x1f0] ss:$8 sps:$4 sm:$0xff]   ;;  %v1418_v38 = vld [vmem:[#allocation5 + $0xe0] ss:$8 sps:$4 sm:$0xff]  }
  0x41   :  { %v1419_v37 = vld [vmem:[#allocation5 + $0x1e4] ss:$8 sps:$4 sm:$0xff]   ;;  %v1422_v39 = vld [vmem:[#allocation5 + $0xd4] ss:$8 sps:$4 sm:$0xff]   ;;  %v1421_v40 = vld [vmem:[#allocation5 + $0x1e0] ss:$8 sps:$4 sm:$0xff]  }
  0x42   :  { %706 = vmatpush1.bf16.msra.mxu0 %v1382_v14  ;;  %v1425_v41 = vld [vmem:[#allocation5 + $0x1d4] ss:$8 sps:$4 sm:$0xff]   ;;  %v1424_v42 = vld [vmem:[#allocation5 + $0xd0] ss:$8 sps:$4 sm:$0xff]   ;;  %v1428_v43 = vld [vmem:[#allocation5 + $0xc4] ss:$8 sps:$4 sm:$0xff]  }
  0x43   :  { %707 = vmatprep.subr.bf16.mxu0 %v1386_v15  ;;  %747 = vmatpush1.bf16.msra.mxu1 %v1385_v16  ;;  %v1427_v44 = vld [vmem:[#allocation5 + $0x1d0] ss:$8 sps:$4 sm:$0xff]   ;;  %v1431_v45 = vld [vmem:[#allocation5 + $0x1c4] ss:$8 sps:$4 sm:$0xff]   ;;  %v1430_v47 = vld [vmem:[#allocation5 + $0xc0] ss:$8 sps:$4 sm:$0xff]  }
  0x44   :  { %748 = vmatprep.subr.bf16.mxu1 %v1389_v17  ;;  %v82_v46 = vld [vmem:[#allocation2 + $0x8] sm:$0xff]  ;;  %v84_v50 = vld [vmem:[#allocation2 + $0x18] sm:$0xff]  ;;  %v81_v4 = vld [vmem:[#allocation2] sm:$0xff]  ;;  %vm695_vm0 = vcmask 130048   ;;  %vm1651_vm1 = vmmov 0   ;;  %s1652_s26 = smov [#allocation10]  }
  0x45   :  { %v89_v48 = vpack.c.bf16 %v82_v46, %v82_v46  ;;  %v1434_v49 = vld [vmem:[#allocation5 + $0xb4] ss:$8 sps:$4 sm:$0xff]   ;;  %v1433_v51 = vld [vmem:[#allocation5 + $0x1c0] ss:$8 sps:$4 sm:$0xff]   ;;  %v91_v52 = vpack.c.bf16 %v84_v50, %v84_v50  ;;  %v1436_v54 = vld [vmem:[#allocation5 + $0xb0] ss:$8 sps:$4 sm:$0xff]   ;;  %v88_v7 = vpack.c.bf16 %v81_v4, %v81_v4 }
  0x46   :  { %708 = vmatpush1.bf16.msra.mxu0 %v1388_v18  ;;  %v1437_v53 = vld [vmem:[#allocation5 + $0x1b4] ss:$8 sps:$4 sm:$0xff]   ;;  %v1440_v55 = vld [vmem:[#allocation5 + $0xa4] ss:$8 sps:$4 sm:$0xff]   ;;  %v1439_v56 = vld [vmem:[#allocation5 + $0x1b0] ss:$8 sps:$4 sm:$0xff]  }
  0x47   :  { %709 = vmatprep.subr.bf16.mxu0 %v1392_v19  ;;  %749 = vmatpush1.bf16.msra.mxu1 %v1391_v20  ;;  %v1443_v57 = vld [vmem:[#allocation5 + $0x1a4] ss:$8 sps:$4 sm:$0xff]   ;;  %v1442_v58 = vld [vmem:[#allocation5 + $0xa0] ss:$8 sps:$4 sm:$0xff]   ;;  %v1446_v59 = vld [vmem:[#allocation5 + $0x94] ss:$8 sps:$4 sm:$0xff]  }
  0x48   :  { %750 = vmatprep.subr.bf16.mxu1 %v1395_v21  ;;  %731 = vmatprep.mubr.bf16.mxu0 %v89_v48  ;;  %v1445_v60 = vld [vmem:[#allocation5 + $0x1a0] ss:$8 sps:$4 sm:$0xff]   ;;  %v1449_v61 = vld [vmem:[#allocation5 + $0x194] ss:$8 sps:$4 sm:$0xff]   ;;  %v1448_v62 = vld [vmem:[#allocation5 + $0x90] ss:$8 sps:$4 sm:$0xff]  }
  0x49   :  { %772 = vmatprep.mubr.bf16.mxu1 %v91_v52  ;;  %v1452_v63 = vld [vmem:[#allocation5 + $0x84] ss:$8 sps:$4 sm:$0xff]   ;;  %v1451_v0 = vld [vmem:[#allocation5 + $0x190] ss:$8 sps:$4 sm:$0xff]   ;;  %v1454_v1 = vld [vmem:[#allocation5 + $0x80] ss:$8 sps:$4 sm:$0xff]  }
  0x4a   :  { %710 = vmatpush1.bf16.msra.mxu0 %v1394_v22  ;;  %v1455_v2 = vld [vmem:[#allocation5 + $0x184] ss:$8 sps:$4 sm:$0xff]   ;;  %v1457_v3 = vld [vmem:[#allocation5 + $0x180] ss:$8 sps:$4 sm:$0xff]   ;;  %v1460_v5 = vld [vmem:[#allocation5 + $0x274] ss:$8 sps:$4 sm:$0xff]  }
  0x4b   :  { %711 = vmatprep.subr.bf16.mxu0 %v1398_v23  ;;  %751 = vmatpush1.bf16.msra.mxu1 %v1397_v24  ;;  %v83_v6 = vld [vmem:[#allocation2 + $0x10] sm:$0xff]  ;;  %v1463_v9 = vld [vmem:[#allocation5 + $0x264] ss:$8 sps:$4 sm:$0xff]   ;;  %v1503_v11 = vld [vmem:[#allocation5 + $0x300] ss:$8 sps:$4 sm:$0xff]   ;;  %v1649_v19 = vmov 0  }
  0x4c   :  { %752 = vmatprep.subr.bf16.mxu1 %v1401_v25  ;;  %v1458_v8 = vld [vmem:[#allocation5 + $0x270] ss:$8 sps:$4 sm:$0xff]   ;;  %v90_v10 = vpack.c.bf16 %v83_v6, %v83_v6  ;;  %v1505_v12 = vld [vmem:[#allocation5 + $0x304] ss:$8 sps:$4 sm:$0xff]   ;;  %v1461_v13 = vld [vmem:[#allocation5 + $0x260] ss:$8 sps:$4 sm:$0xff]  }
  0x4d   :  { %v1466_v14 = vld [vmem:[#allocation5 + $0x254] ss:$8 sps:$4 sm:$0xff]   ;;  %v1464_v18 = vld [vmem:[#allocation5 + $0x250] ss:$8 sps:$4 sm:$0xff]   ;;  %v1469_v20 = vld [vmem:[#allocation5 + $0x244] ss:$8 sps:$4 sm:$0xff]  }
  0x4e   :  { %712 = vmatpush1.bf16.msra.mxu0 %v1400_v26  ;;  %v87_v15 = vld [vmem:[#allocation2 + $0x30] sm:$0xff]  ;;  %v86_v16 = vld [vmem:[#allocation2 + $0x28] sm:$0xff]  ;;  %v1467_v22 = vld [vmem:[#allocation5 + $0x240] ss:$8 sps:$4 sm:$0xff]   ;;  %s1163_s27 = sshll.u32 %s1652_s26, 4  ;;  %s1164_s27 = int_to_ptr.vmem [resolvable:$true] %s1163_s27 }
  0x4f   :  { %713 = vmatprep.subr.bf16.mxu0 %v1404_v27  ;;  %753 = vmatpush1.bf16.msra.mxu1 %v1403_v28  ;;  %v93_v17 = vpack.c.bf16 %v86_v16, %v86_v16  ;;  %v94_v21 = vpack.c.bf16 %v87_v15, %v87_v15  ;;  %v1472_v23 = vld [vmem:[#allocation5 + $0x234] ss:$8 sps:$4 sm:$0xff]   ;;  %v1470_v24 = vld [vmem:[#allocation5 + $0x230] ss:$8 sps:$4 sm:$0xff]   ;;  %v1475_v25 = vld [vmem:[#allocation5 + $0x224] ss:$8 sps:$4 sm:$0xff]   ;;  %p1618_p7 = scmp.lt.s32.totalorder %s1164_s27, %s1164_s27 }
  0x50   :  { %754 = vmatprep.subr.bf16.mxu1 %v1407_v29  ;;  %v1473_v26 = vld [vmem:[#allocation5 + $0x220] ss:$8 sps:$4 sm:$0xff]   ;;  %v1478_v27 = vld [vmem:[#allocation5 + $0x214] ss:$8 sps:$4 sm:$0xff]   ;;  %v1476_v28 = vld [vmem:[#allocation5 + $0x210] ss:$8 sps:$4 sm:$0xff]  }
  0x51   :  { %v1481_v29 = vld [vmem:[#allocation5 + $0x204] ss:$8 sps:$4 sm:$0xff]   ;;  %v1506_v46 = vld [vmem:[#allocation5 + $0x280] ss:$8 sps:$4 sm:$0xff]  }
  0x52   :  { %714 = vmatpush1.bf16.msra.mxu0 %v1406_v30  ;;  %v1479_v30 = vld [vmem:[#allocation5 + $0x200] ss:$8 sps:$4 sm:$0xff]  }
  0x53   :  { %715 = vmatprep.subr.bf16.mxu0 %v1410_v31  ;;  %755 = vmatpush1.bf16.msra.mxu1 %v1409_v32  ;;  %v1484_v31 = vld [vmem:[#allocation5 + $0x2f4] ss:$8 sps:$4 sm:$0xff]   ;;  %v1482_v32 = vld [vmem:[#allocation5 + $0x2f0] ss:$8 sps:$4 sm:$0xff]   ;;  %v1510_v50 = vld [vmem:[#allocation7 + $0x38] sm:$0xff]  }
  0x54   :  { %756 = vmatprep.subr.bf16.mxu1 %v1413_v33  ;;  %v1487_v33 = vld [vmem:[#allocation5 + $0x2e4] ss:$8 sps:$4 sm:$0xff]  }
  0x55   :  { %v1512_v52 = vld [vmem:[#allocation7 + $0x30] sm:$0xff]  }
  0x56   :  { %716 = vmatpush2.bf16.msra.mxu0 %v1412_v34  ;;  %v1485_v34 = vld [vmem:[#allocation5 + $0x2e0] ss:$8 sps:$4 sm:$0xff]  }
  0x57   :  { %717 = vmatprep.subr.bf16.mxu0 %v1416_v35  ;;  %757 = vmatpush2.bf16.msra.mxu1 %v1415_v36  ;;  %v1490_v35 = vld [vmem:[#allocation5 + $0x2d4] ss:$8 sps:$4 sm:$0xff]   ;;  %v1488_v36 = vld [vmem:[#allocation5 + $0x2d0] ss:$8 sps:$4 sm:$0xff]  }
  0x58   :  { %758 = vmatprep.subr.bf16.mxu1 %v1419_v37  ;;  %v1493_v37 = vld [vmem:[#allocation5 + $0x2c4] ss:$8 sps:$4 sm:$0xff]  }
  0x5a   :  { %718 = vmatpush2.bf16.msra.mxu0 %v1418_v38  ;;  %v1491_v38 = vld [vmem:[#allocation5 + $0x2c0] ss:$8 sps:$4 sm:$0xff]  }
  0x5b   :  { %719 = vmatprep.subr.bf16.mxu0 %v1422_v39  ;;  %759 = vmatpush2.bf16.msra.mxu1 %v1421_v40  ;;  %v1496_v39 = vld [vmem:[#allocation5 + $0x2b4] ss:$8 sps:$4 sm:$0xff]   ;;  %v1494_v40 = vld [vmem:[#allocation5 + $0x2b0] ss:$8 sps:$4 sm:$0xff]  }
  0x5c   :  { %760 = vmatprep.subr.bf16.mxu1 %v1425_v41  ;;  %v1499_v41 = vld [vmem:[#allocation5 + $0x2a4] ss:$8 sps:$4 sm:$0xff]  }
  0x5e   :  { %720 = vmatpush2.bf16.msra.mxu0 %v1424_v42  ;;  %v1497_v42 = vld [vmem:[#allocation5 + $0x2a0] ss:$8 sps:$4 sm:$0xff]  }
  0x5f   :  { %721 = vmatprep.subr.bf16.mxu0 %v1428_v43  ;;  %761 = vmatpush2.bf16.msra.mxu1 %v1427_v44  ;;  %v1502_v43 = vld [vmem:[#allocation5 + $0x294] ss:$8 sps:$4 sm:$0xff]   ;;  %v1500_v44 = vld [vmem:[#allocation5 + $0x290] ss:$8 sps:$4 sm:$0xff]  }
  0x60   :  { %762 = vmatprep.subr.bf16.mxu1 %v1431_v45  ;;  %v1508_v45 = vld [vmem:[#allocation5 + $0x284] ss:$8 sps:$4 sm:$0xff]  }
  0x62   :  { %722 = vmatpush2.bf16.msra.mxu0 %v1430_v47  ;;  %v85_v47 = vld [vmem:[#allocation2 + $0x20] sm:$0xff] }
  0x63   :  { %723 = vmatprep.subr.bf16.mxu0 %v1434_v49  ;;  %763 = vmatpush2.bf16.msra.mxu1 %v1433_v51  ;;  %v92_v48 = vpack.c.bf16 %v85_v47, %v85_v47  ;;  %v1509_v49 = vld [vmem:[#allocation7 + $0x78] sm:$0xff]   ;;  %v1511_v51 = vld [vmem:[#allocation7 + $0x70] sm:$0xff]  }
  0x64   :  { %764 = vmatprep.subr.bf16.mxu1 %v1437_v53  ;;  %v1513_v53 = vld [vmem:[#allocation7 + $0x68] sm:$0xff]  }
  0x66   :  { %724 = vmatpush2.bf16.msra.mxu0 %v1436_v54  ;;  %v1514_v54 = vld [vmem:[#allocation7 + $0x28] sm:$0xff]  }
  0x67   :  { %725 = vmatprep.subr.bf16.mxu0 %v1440_v55  ;;  %765 = vmatpush2.bf16.msra.mxu1 %v1439_v56  ;;  %v1515_v55 = vld [vmem:[#allocation7 + $0x60] sm:$0xff]  }
  0x68   :  { %766 = vmatprep.subr.bf16.mxu1 %v1443_v57  ;;  %v1516_v56 = vld [vmem:[#allocation7 + $0x20] sm:$0xff]   ;;  %v1517_v57 = vld [vmem:[#allocation7 + $0x58] sm:$0xff]  }
  0x6a   :  { %726 = vmatpush2.bf16.msra.mxu0 %v1442_v58  ;;  %v1518_v58 = vld [vmem:[#allocation7 + $0x18] sm:$0xff]  }
  0x6b   :  { %727 = vmatprep.subr.bf16.mxu0 %v1446_v59  ;;  %767 = vmatpush2.bf16.msra.mxu1 %v1445_v60  ;;  %v1519_v59 = vld [vmem:[#allocation7 + $0x50] sm:$0xff]  }
  0x6c   :  { %768 = vmatprep.subr.bf16.mxu1 %v1449_v61  ;;  %v1520_v60 = vld [vmem:[#allocation7 + $0x10] sm:$0xff]   ;;  %v1521_v61 = vld [vmem:[#allocation7 + $0x48] sm:$0xff]  }
  0x6e   :  { %728 = vmatpush2.bf16.msra.mxu0 %v1448_v62  ;;  %v1522_v62 = vld [vmem:[#allocation7 + $0x8] sm:$0xff]  }
  0x6f   :  { %729 = vmatprep.subr.bf16.mxu0 %v1452_v63  ;;  %769 = vmatpush2.bf16.msra.mxu1 %v1451_v0  ;;  %v1523_v63 = vld [vmem:[#allocation7 + $0x40] sm:$0xff]  }
  0x70   :  { %770 = vmatprep.subr.bf16.mxu1 %v1455_v2  ;;  %v1524_v0 = vld [vmem:[#allocation7] sm:$0xff]  }
  0x72   :  { %730 = vmatpush2.bf16.msra.mxu0 %v1454_v1  ;;  %v1650_v1 = vmov 0.0  }
  0x73   :  { %781 = vmatprep.subr.bf16.mxu0 %v1460_v5  ;;  %771 = vmatpush2.bf16.msra.mxu1 %v1457_v3 }
  0x74   :  { %836 = vmatprep.subr.bf16.mxu1 %v1505_v12 }
  0x75   :  { %732 = vmatmul.mubr.bf16.vlgmr.msra.gmra.mxu0 %v88_v7 }
  0x76   :  { %782 = vmatpush1.bf16.msra.mxu0 %v1458_v8  ;;  %773 = vmatmul.mubr.bf16.vlgmr.msra.gmra.mxu1 %v90_v10 }
  0x77   :  { %783 = vmatprep.subr.bf16.mxu0 %v1463_v9  ;;  %837 = vmatpush1.bf16.msra.mxu1 %v1503_v11 }
  0x78   :  { %854 = vmatprep.mubr.bf16.mxu1 %v1649_v19  ;;  %813 = vmatprep.mubr.bf16.mxu0 %v93_v17  ;;  %v193_v17 = vld [vmem:[%s1729_s2] sm:$0x3] }
  0x79   :  { %1299 = vmatprep.subr.bf16.mxu1 %v1509_v49 }
  0x7a   :  { %784 = vmatpush1.bf16.msra.mxu0 %v1461_v13 }
  0x7b   :  { %785 = vmatprep.subr.bf16.mxu0 %v1466_v14  ;;  %v195_v14 = vlaneseq }
  0x7d   :  { %v196_v15 = vshrl.u32 %v195_v14, 7 }
  0x7e   :  { %786 = vmatpush1.bf16.msra.mxu0 %v1464_v18  ;;  %1272 = vmatmul.mubr.msk.bf16.vlgmr.msra.gmra.mxu1 %vm695_vm0, %v94_v21 }
  0x7f   :  { %787 = vmatprep.subr.bf16.mxu0 %v1469_v20  ;;  %1300 = vmatpush3.bf16.msra.mxu1 %v1510_v50  ;;  %v197_v16 = vsub.s32 0, %v196_v15  ;;  %v201_v18 = vsub.s32 1, %v196_v15 }
  0x80   :  { %1301 = vmatprep.subr.bf16.mxu1 %v1511_v51 }
  0x81   :  { %v198_v19 = vrot.slane %v193_v17, %v197_v16  ;;  %v202_v20 = vrot.slane %v193_v17, %v201_v18 }
  0x82   :  { %788 = vmatpush1.bf16.msra.mxu0 %v1467_v22 }
  0x83   :  { %789 = vmatprep.subr.bf16.mxu0 %v1472_v23  ;;  %1302 = vmatpush3.bf16.msra.mxu1 %v1512_v52 }
  0x84   :  { %1303 = vmatprep.subr.bf16.mxu1 %v1513_v53 }
  0x86   :  { %790 = vmatpush1.bf16.msra.mxu0 %v1470_v24 }
  0x87   :  { %791 = vmatprep.subr.bf16.mxu0 %v1475_v25  ;;  %1304 = vmatpush3.bf16.msra.mxu1 %v1514_v54  ;;  %v1290_v54 = vld [vmem:[%s1733_s6] ss:$0 sm:$0xff] }
  0x88   :  { %1305 = vmatprep.subr.bf16.mxu1 %v1515_v55 }
  0x8a   :  { %792 = vmatpush1.bf16.msra.mxu0 %v1473_v26 }
  0x8b   :  { %793 = vmatprep.subr.bf16.mxu0 %v1478_v27  ;;  %1306 = vmatpush3.bf16.msra.mxu1 %v1516_v56 }
  0x8c   :  { %1307 = vmatprep.subr.bf16.mxu1 %v1517_v57 }
  0x8e   :  { %794 = vmatpush1.bf16.msra.mxu0 %v1476_v28 }
  0x8f   :  { %795 = vmatprep.subr.bf16.mxu0 %v1481_v29  ;;  %1308 = vmatpush3.bf16.msra.mxu1 %v1518_v58 }
  0x90   :  { %1309 = vmatprep.subr.bf16.mxu1 %v1519_v59 }
  0x92   :  { %796 = vmatpush1.bf16.msra.mxu0 %v1479_v30 }
  0x93   :  { %797 = vmatprep.subr.bf16.mxu0 %v1484_v31  ;;  %1310 = vmatpush3.bf16.msra.mxu1 %v1520_v60 }
  0x94   :  { %1311 = vmatprep.subr.bf16.mxu1 %v1521_v61 }
  0x96   :  { %798 = vmatpush2.bf16.msra.mxu0 %v1482_v32 }
  0x97   :  { %799 = vmatprep.subr.bf16.mxu0 %v1487_v33  ;;  %1312 = vmatpush3.bf16.msra.mxu1 %v1522_v62 }
  0x98   :  { %1313 = vmatprep.subr.bf16.mxu1 %v1523_v63 }
  0x9a   :  { %800 = vmatpush2.bf16.msra.mxu0 %v1485_v34 }
  0x9b   :  { %801 = vmatprep.subr.bf16.mxu0 %v1490_v35  ;;  %1314 = vmatpush3.bf16.msra.mxu1 %v1524_v0 }
  0x9c   :  { %1330 = vmatprep.subr.bf16.mxu1 %v1650_v1 }
  0x9e   :  { %802 = vmatpush2.bf16.msra.mxu0 %v1488_v36  ;;  %v1525_v36 = vld [vmem:[#allocation8 + $0x38] sm:$0xff]  }
  0x9f   :  { %803 = vmatprep.subr.bf16.mxu0 %v1493_v37 }
  0xa2   :  { %804 = vmatpush2.bf16.msra.mxu0 %v1491_v38  ;;  %v1526_v38 = vld [vmem:[#allocation8 + $0x30] sm:$0xff]  }
  0xa3   :  { %805 = vmatprep.subr.bf16.mxu0 %v1496_v39  ;;  %v1527_v39 = vld [vmem:[#allocation8 + $0x28] sm:$0xff]  }
  0xa6   :  { %806 = vmatpush2.bf16.msra.mxu0 %v1494_v40  ;;  %v1528_v40 = vld [vmem:[#allocation8 + $0x20] sm:$0xff]  }
  0xa7   :  { %807 = vmatprep.subr.bf16.mxu0 %v1499_v41  ;;  %v1529_v41 = vld [vmem:[#allocation8 + $0x18] sm:$0xff]  }
  0xaa   :  { %808 = vmatpush2.bf16.msra.mxu0 %v1497_v42  ;;  %v1530_v42 = vld [vmem:[#allocation8 + $0x10] sm:$0xff]  }
  0xab   :  { %809 = vmatprep.subr.bf16.mxu0 %v1502_v43  ;;  %v1531_v43 = vld [vmem:[#allocation8 + $0x8] sm:$0xff]  }
  0xae   :  { %810 = vmatpush2.bf16.msra.mxu0 %v1500_v44  ;;  %v1532_v44 = vld [vmem:[#allocation8] sm:$0xff]  }
  0xaf   :  { %811 = vmatprep.subr.bf16.mxu0 %v1508_v45 }
  0xb2   :  { %812 = vmatpush2.bf16.msra.mxu0 %v1506_v46  ;;  %v1273_v46 = vld [vmem:[%s1731_s4] ss:$0 sm:$0xff]  ;;  %s1613_s4 = scalar_lea.vmem %s1164_s27, 64 }
  0xb3   :  { %p1614_p6 = scmp.ne.s32.totalorder %s1164_s27, %s1613_s4  ;;  %p1619_p8 = scmp.lt.s32.totalorder %s1613_s4, %s1613_s4 }
  0xb5   :  { %814 = vmatmul.mubr.bf16.vlgmr.msra.gmra.mxu0 %v92_v48  ;;  %p1620_p9 = por %p1619_p8, %p1618_p7 }
  0xb7   :  { %p1621_p10 = pnand %p1620_p9, %p1614_p6 }
 0x135   :  { %v733_v2 = vpop.f32.mrf.mxu0 }
 0x136   :  { %v774_v4 = vpop.f32.mrf.mxu1  ;;  %v734_v21 = vadd.f32 %v733_v2, %v198_v19 }
 0x137   :  { %v735_v3 = vpop.f32.mrf.mxu0 }
 0x138   :  { %v776_v6 = vpop.f32.mrf.mxu1  ;;  %v736_v22 = vadd.f32 %v735_v3, %v202_v20  ;;  %v775_v23 = vadd.f32 %v774_v4, %v734_v21 }
 0x139   :  { %v737_v5 = vpop.f32.mrf.mxu0 }
 0x13a   :  { %v778_v8 = vpop.f32.mrf.mxu1  ;;  %v777_v25 = vadd.f32 %v776_v6, %v736_v22 }
 0x13b   :  { %v738_v7 = vpop.f32.mrf.mxu0 }
 0x13c   :  { %v779_v9 = vpop.f32.mrf.mxu1 }
 0x13e   :  { %v856_v10 = vpop.f32.mrf.mxu1 }
 0x140   :  { %v858_v11 = vpop.f32.mrf.mxu1 }
 0x142   :  { %v860_v12 = vpop.f32.mrf.mxu1 }
 0x144   :  { %v861_v13 = vpop.f32.mrf.mxu1 }
 0x175   :  { %v815_v24 = vpop.f32.mrf.mxu0 }
 0x176   :  { %v816_v26 = vadd.f32 %v815_v24, %v775_v23 }
 0x177   :  { %v817_v27 = vpop.f32.mrf.mxu0 }
 0x178   :  { %v857_v28 = vadd.f32 %v856_v10, %v816_v26  ;;  %v818_v29 = vadd.f32 %v817_v27, %v777_v25 }
 0x179   :  { %v819_v30 = vpop.f32.mrf.mxu0 }
 0x17a   :  { %v859_v31 = vadd.f32 %v858_v11, %v818_v29  ;;  %v863_v32 = vmax.f32 %v857_v28, 0.0 }
 0x17b   :  { %v820_v33 = vpop.f32.mrf.mxu0 }
 0x17c   :  { %v864_v34 = vmax.f32 %v859_v31, 0.0  ;;  %v865_v37 = vpack.c.bf16 %v863_v32, %v863_v32 }
 0x17e   :  { %v866_v35 = vpack.c.bf16 %v864_v34, %v864_v34 }
 0x180   :  { %1034 = vmatprep.mubr.bf16.mxu1 %v866_v35 }
 0x181   :  { %1035 = vmatmul.mubr.bf16.vlgmr.msra.gmra.mxu1 %v865_v37 }
 0x182   :  { %1331 = vmatpush3.bf16.msra.mxu1 %v1525_v36  ;;  %1346 = vmatprep.mubr.msk.bf16.mxu1 %vm1651_vm1, %v1650_v1 }
 0x183   :  { %1332 = vmatprep.subr.bf16.mxu1 %v1650_v1 }
 0x186   :  { %1333 = vmatpush3.bf16.msra.mxu1 %v1526_v38 }
 0x187   :  { %1334 = vmatprep.subr.bf16.mxu1 %v1650_v1 }
 0x18a   :  { %1335 = vmatpush3.bf16.msra.mxu1 %v1527_v39 }
 0x18b   :  { %1336 = vmatprep.subr.bf16.mxu1 %v1650_v1 }
 0x18e   :  { %1337 = vmatpush3.bf16.msra.mxu1 %v1528_v40 }
 0x18f   :  { %1338 = vmatprep.subr.bf16.mxu1 %v1650_v1 }
 0x192   :  { %1339 = vmatpush3.bf16.msra.mxu1 %v1529_v41 }
 0x193   :  { %1340 = vmatprep.subr.bf16.mxu1 %v1650_v1 }
 0x196   :  { %1341 = vmatpush3.bf16.msra.mxu1 %v1530_v42 }
 0x197   :  { %1342 = vmatprep.subr.bf16.mxu1 %v1650_v1 }
 0x19a   :  { %1343 = vmatpush3.bf16.msra.mxu1 %v1531_v43 }
 0x19b   :  { %1344 = vmatprep.subr.bf16.mxu1 %v1650_v1 }
 0x19e   :  { %1345 = vmatpush3.bf16.msra.mxu1 %v1532_v44 }
 0x241   :  { %v1315_v45 = vpop.f32.mrf.mxu1 }
 0x243   :  { %v1316_v47 = vpop.f32.mrf.mxu1 }
 0x244   :  { %v1317_v48 = vadd.f32 %v1316_v47, %v1315_v45 }
 0x245   :  { %v1318_v49 = vpop.f32.mrf.mxu1 }
 0x246   :  { %v1037_v50 = vadd.f32 %v1317_v48, %v1273_v46 }
 0x247   :  { %v1319_v51 = vpop.f32.mrf.mxu1 }
 0x248   :  { %v1042_v52 = vmax.f32 %v1037_v50, 0.0 }
 0x24a   :  { %v1043_v53 = vpack.c.bf16 %v1042_v52, %v1042_v52 }
 0x24c   :  { %1347 = vmatmul.mubr.bf16.vlgmr.msra.gmra.mxu1 %v1043_v53 }
 0x30c   :  { %v1149_v55 = vpop.f32.mrf.mxu1 }
 0x30d   :  { %v1150_v56 = vadd.f32 %v1290_v54, %v1149_v55 }
 0x30e   :  { %v1348_v57 = vpop.f32.mrf.mxu1 }
 0x30f   :  { %v1155_v58 = vpack.c.bf16 %v1150_v56, %v1150_v56 }
 0x310   :  { %v1152_v59 = vpop.f32.mrf.mxu1 }
 0x311   :  { %1156 = vst [vmem:[#allocation10] sm:$0xf] %v1155_v58 }
 0x312   :  { %v1349_v60 = vpop.f32.mrf.mxu1 }
 0x313   :  { %1624 = shalt.err (!%p1621_p10)
}
 0x314   :  { %1166 = dma.vmem_to_hbm [thread:$0]  %s1164_s27, 64, %s1734_s7, [#allocation4]  }
 0x315   :  { %1639 = dma.done.wait [#allocation4], 64  }
 0x316   :  { %1640 = vsyncadd [#allocation4], 4294967232 }
 0x317   :  { %1170 = vsyncpa [#allocation3], 1 }
 0x318   :  { %1171 = vsyncpa [#allocation6], 1 }
 0x319   :  { %1172 = vsyncpa [#allocation9], 1 }
 0x31a   :  { %1173 = vsyncpa [#allocation4], 1 }

</bundles_post_ra>
